<compile_context>
chip_gen: v7x
topology: tpu7x:2x2x1
jax: 0.10.0
libtpu: 0.0.40
codegen_flags: <defaults>
</compile_context>

<pallas_src>
import numpy as np
import jax
import jax.numpy as jnp
from jax import lax
from jax.experimental import pallas as pl
from jax.experimental.pallas import tpu as pltpu


# ------------------------- tiling heuristics -------------------------
def _round_up(x, m):
    return ((x + m - 1) // m) * m


def _pick_block_b(B):
    """Big tiles to amortize grid-step overhead, but at least 2 'parallel'
    steps of >=128 rows when B allows (v7x has 2 TensorCores)."""
    if B < 256:
        return _round_up(B, 8)
    tile = min(2048, B // 2)
    return max(128, (tile // 128) * 128)


def _pick_sub_rows(block_b):
    """Rows per inner unrolled iteration: keeps the f32 hidden activation
    (~sub*H*4 bytes) inside the 64-vreg file instead of spilling to VMEM."""
    if block_b % 256 == 0 and block_b > 256:
        return 256
    if block_b % 128 == 0 and block_b > 128:
        return 128
    return block_b


# ------------------------- Pallas kernel (built per static config) -------------------------
def make_fusion_mlp_kernel(num_inputs, num_layers, sub_rows, n_sub):
    """num_layers == number of Linear+ReLU layers (1 + (num_layers-1) in the ctor)."""

    def kernel(*refs):
        idx = 0
        x_refs = refs[idx:idx + num_inputs]; idx += num_inputs
        w1_ref = refs[idx]; b1_ref = refs[idx + 1]; idx += 2
        hidden = []
        for _ in range(num_layers - 1):
            hidden.append((refs[idx], refs[idx + 1])); idx += 2
        wo_ref = refs[idx]; bo_ref = refs[idx + 1]; idx += 2
        out_ref = refs[idx]

        # Hoist the (tiny, grid-invariant) weight/bias loads out of the row loop.
        w1 = w1_ref[...]
        b1 = b1_ref[...]
        wh = [(w_ref[...], b_ref[...]) for (w_ref, b_ref) in hidden]
        wo = wo_ref[...]
        bo = bo_ref[...]

        def compute_rows(row):
            # Concat fused away from HBM: lane-concat the per-input sub-tiles
            # in-register, then a single MXU pass against the full W1.
            x_cat = jnp.concatenate(
                [x_ref[pl.ds(row, sub_rows), :].astype(jnp.float32)
                 for x_ref in x_refs],
                axis=-1).astype(jnp.bfloat16)
            h = jnp.dot(x_cat, w1, preferred_element_type=jnp.float32)
            h = jnp.maximum(h + b1, 0.0)                       # bias + ReLU in f32
            for w, b in wh:                                    # hidden Linear+ReLU
                h = jnp.dot(h.astype(jnp.bfloat16), w,
                            preferred_element_type=jnp.float32) + b
                h = jnp.maximum(h, 0.0)
            out = jnp.dot(h.astype(jnp.bfloat16), wo,          # output projection
                          preferred_element_type=jnp.float32) + bo
            out_ref[pl.ds(row, sub_rows), :] = out.astype(out_ref.dtype)

        if n_sub == 1:
            compute_rows(0)
        else:
            def body(s, carry):
                compute_rows(pl.multiple_of(s * sub_rows, sub_rows))
                return carry
            lax.fori_loop(0, n_sub, body, None, unroll=True)

    return kernel


# ------------------------- wrapper -------------------------
def fusion_mlp_forward(inputs, params, *, block_b=None, out_dtype=None):
    inputs = list(inputs)
    B = int(inputs[0].shape[0])
    in_dims = [int(x.shape[1]) for x in inputs]
    num_inputs = len(inputs)
    num_layers = 1 + len(params["w_hidden"])
    H = int(params["b1"].shape[-1])
    N_out = int(params["w_out"].shape[1])
    if out_dtype is None:
        out_dtype = inputs[0].dtype        # bf16 in -> bf16 out (halves write bytes)

    if block_b is None:
        block_b = _pick_block_b(B)
    block_b = max(8, _round_up(min(block_b, _round_up(B, 8)), 8))
    sub_rows = _pick_sub_rows(block_b)
    n_sub = block_b // sub_rows

    # Pad the batch so it tiles evenly (padded rows are computed and dropped).
    B_pad = _round_up(B, block_b)
    if B_pad != B:
        inputs = [jnp.pad(x, ((0, B_pad - B), (0, 0))) for x in inputs]
    grid = (B_pad // block_b,)

    def replicated(shape):
        return pl.BlockSpec(shape, lambda i: (0,) * len(shape))

    # bf16 weights (tiny one-time cast; a real model would store them bf16);
    # biases stay f32 (the accumulation dtype).
    w1 = params["w1"].astype(jnp.bfloat16)
    w_hidden = [w.astype(jnp.bfloat16) for w in params["w_hidden"]]
    w_out = params["w_out"].astype(jnp.bfloat16)

    operands, in_specs = [], []
    for x, d in zip(inputs, in_dims):
        operands.append(x)
        in_specs.append(pl.BlockSpec((block_b, d), lambda i: (i, 0)))
    operands += [w1, params["b1"].reshape(1, H).astype(jnp.float32)]
    in_specs += [replicated(w1.shape), replicated((1, H))]
    for w, b in zip(w_hidden, params["b_hidden"]):
        operands += [w, b.reshape(1, H).astype(jnp.float32)]
        in_specs += [replicated(w.shape), replicated((1, H))]
    operands += [w_out, params["b_out"].reshape(1, N_out).astype(jnp.float32)]
    in_specs += [replicated(w_out.shape), replicated((1, N_out))]

    kernel = make_fusion_mlp_kernel(num_inputs, num_layers, sub_rows, n_sub)

    out = pl.pallas_call(
        kernel,
        out_shape=jax.ShapeDtypeStruct((B_pad, N_out), out_dtype),
        grid_spec=pltpu.PrefetchScalarGridSpec(
            num_scalar_prefetch=0,
            grid=grid,
            in_specs=in_specs,
            out_specs=pl.BlockSpec((block_b, N_out), lambda i: (i, 0)),
        ),
        compiler_params=pltpu.CompilerParams(
            dimension_semantics=("parallel",),
        ),
    )(*operands)
    return out[:B] if B_pad != B else out


# ------------------------- deterministic param init (matches nn.Linear defaults) -------------------------
def linear_init(key, d_in, d_out):
    """nn.Linear default init: U(-1/sqrt(d_in), 1/sqrt(d_in)); returned as (in, out)."""
    kw, kb = jax.random.split(key)
    bound = 1.0 / np.sqrt(d_in)
    w = jax.random.uniform(kw, (d_out, d_in), jnp.float32, -bound, bound)  # torch layout
    b = jax.random.uniform(kb, (d_out,), jnp.float32, -bound, bound)
    return jnp.asarray(w.T), b                                             # (in, out) for x @ W


def make_params(key, total_input_dim, hidden_dim, output_dim, num_layers):
    keys = jax.random.split(key, num_layers + 1)
    w1, b1 = linear_init(keys[0], total_input_dim, hidden_dim)
    w_hidden, b_hidden = [], []
    for i in range(num_layers - 1):
        w, b = linear_init(keys[1 + i], hidden_dim, hidden_dim)
        w_hidden.append(w); b_hidden.append(b)
    w_out, b_out = linear_init(keys[num_layers], hidden_dim, output_dim)
    return dict(w1=w1, b1=b1, w_hidden=w_hidden, b_hidden=b_hidden,
                w_out=w_out, b_out=b_out)


# ------------------------- pure-JAX (f32) reference -------------------------
def reference_forward(inputs, p):
    x = jnp.concatenate([xi.astype(jnp.float32) for xi in inputs], axis=1)
    h = jnp.maximum(x @ p["w1"] + p["b1"], 0.0)
    for w, b in zip(p["w_hidden"], p["b_hidden"]):
        h = jnp.maximum(h @ w + b, 0.0)
    return h @ p["w_out"] + p["b_out"]


if __name__ == "__main__":
    # FusionMLP(total_input_dim=32, hidden_dim=64, output_dim=16, num_layers=2)
    # applied to two modalities of 16 features each.
    B, D1, D2, HID, OUT, NUM_LAYERS = 256, 16, 16, 64, 16, 2

    key = jax.random.PRNGKey(0)
    k1, k2, kp = jax.random.split(key, 3)
    # Producer emits bf16 activations (no standalone wrapper-side cast).
    x1 = jax.random.normal(k1, (B, D1), jnp.bfloat16)
    x2 = jax.random.normal(k2, (B, D2), jnp.bfloat16)
    params = make_params(kp, D1 + D2, HID, OUT, NUM_LAYERS)

    # Default heuristic -> block_b=128, grid=(2,) "parallel": both v7x TCs get
    # a full-128-row MXU tile; on v5e/v6e it's just 2 cheap serial steps.
    out = fusion_mlp_forward([x1, x2], params)
    out = jax.block_until_ready(out)

    ref = reference_forward([x1, x2], params)
    assert out.shape == (B, OUT)
    # bf16 inputs/weights/output with f32 accumulation vs f32 reference.
    np.testing.assert_allclose(np.asarray(out.astype(jnp.float32)),
                               np.asarray(ref), rtol=3e-2, atol=3e-2)

    print("KERNEL_OK")
</pallas_src>

<mosaic_0001>
module attributes {stable_mosaic.version = 11 : i64} {
  func.func @kernel(%arg0: i32, %arg1: memref<128x16xbf16, #tpu.memory_space<vmem>>, %arg2: memref<128x16xbf16, #tpu.memory_space<vmem>>, %arg3: memref<32x64xbf16, #tpu.memory_space<vmem>>, %arg4: memref<1x64xf32, #tpu.memory_space<vmem>>, %arg5: memref<64x64xbf16, #tpu.memory_space<vmem>>, %arg6: memref<1x64xf32, #tpu.memory_space<vmem>>, %arg7: memref<64x16xbf16, #tpu.memory_space<vmem>>, %arg8: memref<1x16xf32, #tpu.memory_space<vmem>>, %arg9: memref<128x16xbf16, #tpu.memory_space<vmem>>) attributes {dimension_semantics = [#tpu.dimension_semantics<parallel>], iteration_bounds = array<i64: 2>, scalar_prefetch = 0 : i64, scratch_operands = 0 : i64, tpu.core_type = #tpu.core_type<tc>, window_params = [{transform_indices = @transform_0, window_bounds = array<i64: 128, 16>}, {transform_indices = @transform_1, window_bounds = array<i64: 128, 16>}, {pipeline_mode = #tpu.pipeline_mode<synchronous>, transform_indices = @transform_2, window_bounds = array<i64: 32, 64>}, {pipeline_mode = #tpu.pipeline_mode<synchronous>, transform_indices = @transform_3, window_bounds = array<i64: 1, 64>}, {pipeline_mode = #tpu.pipeline_mode<synchronous>, transform_indices = @transform_4, window_bounds = array<i64: 64, 64>}, {pipeline_mode = #tpu.pipeline_mode<synchronous>, transform_indices = @transform_5, window_bounds = array<i64: 1, 64>}, {pipeline_mode = #tpu.pipeline_mode<synchronous>, transform_indices = @transform_6, window_bounds = array<i64: 64, 16>}, {pipeline_mode = #tpu.pipeline_mode<synchronous>, transform_indices = @transform_7, window_bounds = array<i64: 1, 16>}, {transform_indices = @transform_8, window_bounds = array<i64: 128, 16>}]} {
    %c0 = arith.constant 0 : index
    %c0_0 = arith.constant 0 : index
    %0 = vector.load %arg3[%c0, %c0_0] : memref<32x64xbf16, #tpu.memory_space<vmem>>, vector<32x64xbf16>
    %c0_1 = arith.constant 0 : index
    %c0_2 = arith.constant 0 : index
    %1 = vector.load %arg4[%c0_1, %c0_2] : memref<1x64xf32, #tpu.memory_space<vmem>>, vector<1x64xf32>
    %c0_3 = arith.constant 0 : index
    %c0_4 = arith.constant 0 : index
    %2 = vector.load %arg5[%c0_3, %c0_4] : memref<64x64xbf16, #tpu.memory_space<vmem>>, vector<64x64xbf16>
    %c0_5 = arith.constant 0 : index
    %c0_6 = arith.constant 0 : index
    %3 = vector.load %arg6[%c0_5, %c0_6] : memref<1x64xf32, #tpu.memory_space<vmem>>, vector<1x64xf32>
    %c0_7 = arith.constant 0 : index
    %c0_8 = arith.constant 0 : index
    %4 = vector.load %arg7[%c0_7, %c0_8] : memref<64x16xbf16, #tpu.memory_space<vmem>>, vector<64x16xbf16>
    %c0_9 = arith.constant 0 : index
    %c0_10 = arith.constant 0 : index
    %5 = vector.load %arg8[%c0_9, %c0_10] : memref<1x16xf32, #tpu.memory_space<vmem>>, vector<1x16xf32>
    %c0_11 = arith.constant 0 : index
    %c0_12 = arith.constant 0 : index
    %6 = vector.load %arg1[%c0_11, %c0_12] : memref<128x16xbf16, #tpu.memory_space<vmem>>, vector<128x16xbf16>
    %7 = arith.extf %6 : vector<128x16xbf16> to vector<128x16xf32>
    %c0_13 = arith.constant 0 : index
    %c0_14 = arith.constant 0 : index
    %8 = vector.load %arg2[%c0_13, %c0_14] : memref<128x16xbf16, #tpu.memory_space<vmem>>, vector<128x16xbf16>
    %9 = arith.extf %8 : vector<128x16xbf16> to vector<128x16xf32>
    %10 = tpu.concatenate %7, %9 in 1 : vector<128x16xf32>, vector<128x16xf32> -> vector<128x32xf32>
    %11 = arith.truncf %10 : vector<128x32xf32> to vector<128x32xbf16>
    %cst = arith.constant dense<0.000000e+00> : vector<128x64xf32>
    %12 = tpu.matmul %11, %0, %cst {dimension_numbers = #tpu.dot_dimension_numbers<[1], [0], [0], [1], [0, 0, 1, 1], [], []>} : vector<128x32xbf16>, vector<32x64xbf16>, vector<128x64xf32> -> vector<128x64xf32>
    %13 = vector.broadcast %1 : vector<1x64xf32> to vector<128x64xf32>
    %14 = arith.addf %12, %13 : vector<128x64xf32>
    %cst_15 = arith.constant 0.000000e+00 : f32
    %15 = vector.broadcast %cst_15 : f32 to vector<128x64xf32>
    %16 = arith.maximumf %14, %15 : vector<128x64xf32>
    %17 = arith.truncf %16 : vector<128x64xf32> to vector<128x64xbf16>
    %cst_16 = arith.constant dense<0.000000e+00> : vector<128x64xf32>
    %18 = tpu.matmul %17, %2, %cst_16 {dimension_numbers = #tpu.dot_dimension_numbers<[1], [0], [0], [1], [0, 0, 1, 1], [], []>} : vector<128x64xbf16>, vector<64x64xbf16>, vector<128x64xf32> -> vector<128x64xf32>
    %19 = vector.broadcast %3 : vector<1x64xf32> to vector<128x64xf32>
    %20 = arith.addf %18, %19 : vector<128x64xf32>
    %cst_17 = arith.constant 0.000000e+00 : f32
    %21 = vector.broadcast %cst_17 : f32 to vector<128x64xf32>
    %22 = arith.maximumf %20, %21 : vector<128x64xf32>
    %23 = arith.truncf %22 : vector<128x64xf32> to vector<128x64xbf16>
    %cst_18 = arith.constant dense<0.000000e+00> : vector<128x16xf32>
    %24 = tpu.matmul %23, %4, %cst_18 {dimension_numbers = #tpu.dot_dimension_numbers<[1], [0], [0], [1], [0, 0, 1, 1], [], []>} : vector<128x64xbf16>, vector<64x16xbf16>, vector<128x16xf32> -> vector<128x16xf32>
    %25 = vector.broadcast %5 : vector<1x16xf32> to vector<128x16xf32>
    %26 = arith.addf %24, %25 : vector<128x16xf32>
    %27 = arith.truncf %26 : vector<128x16xf32> to vector<128x16xbf16>
    %c0_19 = arith.constant 0 : index
    %c0_20 = arith.constant 0 : index
    %28 = vector.load %arg9[%c0_19, %c0_20] : memref<128x16xbf16, #tpu.memory_space<vmem>>, vector<128x16xbf16>
    tpu.vector_store %arg9[%c0_19, %c0_20], %27 {strides = array<i32>} : memref<128x16xbf16, #tpu.memory_space<vmem>>, vector<128x16xbf16>,
    return
  }
  func.func @transform_0(%arg0: i32) -> (i32, i32) {
    %c0_i32 = arith.constant 0 : i32
    %c0_i32_0 = arith.constant 0 : i32
    return %arg0, %c0_i32 : i32, i32
  }
  func.func @transform_1(%arg0: i32) -> (i32, i32) {
    %c0_i32 = arith.constant 0 : i32
    %c0_i32_0 = arith.constant 0 : i32
    return %arg0, %c0_i32 : i32, i32
  }
  func.func @transform_2(%arg0: i32) -> (i32, i32) {
    %c0_i32 = arith.constant 0 : i32
    %c0_i32_0 = arith.constant 0 : i32
    %c0_i32_1 = arith.constant 0 : i32
    return %c0_i32, %c0_i32_0 : i32, i32
  }
  func.func @transform_3(%arg0: i32) -> (i32, i32) {
    %c0_i32 = arith.constant 0 : i32
    %c0_i32_0 = arith.constant 0 : i32
    %c0_i32_1 = arith.constant 0 : i32
    return %c0_i32, %c0_i32_0 : i32, i32
  }
  func.func @transform_4(%arg0: i32) -> (i32, i32) {
    %c0_i32 = arith.constant 0 : i32
    %c0_i32_0 = arith.constant 0 : i32
    %c0_i32_1 = arith.constant 0 : i32
    return %c0_i32, %c0_i32_0 : i32, i32
  }
  func.func @transform_5(%arg0: i32) -> (i32, i32) {
    %c0_i32 = arith.constant 0 : i32
    %c0_i32_0 = arith.constant 0 : i32
    %c0_i32_1 = arith.constant 0 : i32
    return %c0_i32, %c0_i32_0 : i32, i32
  }
  func.func @transform_6(%arg0: i32) -> (i32, i32) {
    %c0_i32 = arith.constant 0 : i32
    %c0_i32_0 = arith.constant 0 : i32
    %c0_i32_1 = arith.constant 0 : i32
    return %c0_i32, %c0_i32_0 : i32, i32
  }
  func.func @transform_7(%arg0: i32) -> (i32, i32) {
    %c0_i32 = arith.constant 0 : i32
    %c0_i32_0 = arith.constant 0 : i32
    %c0_i32_1 = arith.constant 0 : i32
    return %c0_i32, %c0_i32_0 : i32, i32
  }
  func.func @transform_8(%arg0: i32) -> (i32, i32) {
    %c0_i32 = arith.constant 0 : i32
    %c0_i32_0 = arith.constant 0 : i32
    return %arg0, %c0_i32 : i32, i32
  }
}

</mosaic_0001>

<bundles_post_ra>
// kernel: tpu_custom_call.1
= control target key start
LH: loop header
LB: loop body
LE: loop exit
PB: predicated region body
PF: predicated region fallthrough
CT: control target
= control target key end

     0   :  { %s1527_s27 = smov 0   ;;  %s1679_s0 = inlined_call_operand.vmem [shape: bf16[256,16], index: 0, kind: input, shape index: {}]   ;;  %s1680_s1 = inlined_call_operand.vmem [shape: bf16[256,16], index: 1, kind: input, shape index: {}]   ;;  %s1681_s2 = inlined_call_operand.vmem [shape: bf16[32,64], index: 2, kind: input, shape index: {}]   ;;  %s1682_s3 = inlined_call_operand.vmem [shape: f32[1,64], index: 3, kind: input, shape index: {}]   ;;  %s1683_s4 = inlined_call_operand.vmem [shape: bf16[64,64], index: 4, kind: input, shape index: {}]   ;;  %s1684_s5 = inlined_call_operand.vmem [shape: f32[1,64], index: 5, kind: input, shape index: {}]   ;;  %s1685_s6 = inlined_call_operand.vmem [shape: bf16[64,16], index: 6, kind: input, shape index: {}]   ;;  %s1686_s7 = inlined_call_operand.vmem [shape: f32[1,16], index: 7, kind: input, shape index: {}]   ;;  %s1687_s8 = inlined_call_operand.vmem [shape: bf16[256,16], index: 8, kind: output, shape index: {}]  }
   0x1 LB: > { %s1148_s28 = sadd.s32 4294967295, %s1479_s27   ;;  %p1152_p0 = scmp.ge.s32.totalorder %s1479_s27, 1  ;;  %s1479_s27 = sphi %s1527_s27, %s18_s27  }
   0x2   : > { %p274_p1 = scmp.lt.s32.totalorder %s1479_s27, 3 }
   0x4   : > { %p275_p2 = pnand %p1152_p0, %p274_p1 }
   0x5   : > { %s1153_s29 = sshll.u32 (!%p275_p2), %s1148_s28, 4  ;;  %v1463_v0 = vld [vmem:[%s1681_s2] sm:$0xff] (!%p275_p2)   ;;  %v1464_v1 = vld [vmem:[%s1681_s2 + $0x8] sm:$0xff] (!%p275_p2)   ;;  %s1481_s16 = smov (!%p275_p2), 16   ;;  %vm483_vm0 = vcmask (!%p275_p2), 130048   ;;  %vm526_vm1 = vcmask (!%p275_p2), 261120  }
   0x6   : > { %278 = sbr.rel (%p275_p2) target bundleno = 833 (0x341), region = 52  ;;  %p314_p3 = scmp.lt.s32.totalorder (!%p275_p2), %s1153_s29, 31  ;;  %1342 = vmatprep.subr.bf16.mxu0 (!%p275_p2), %v1463_v0  ;;  %1410 = vmatprep.subr.bf16.mxu1 (!%p275_p2), %v1463_v0  ;;  %v1550_v34 = vld [vmem:[%s1683_s4] sm:$0xff] (!%p275_p2)   ;;  %vm702_vm2 = vcmask (!%p275_p2), 523264   ;;  %vm1063_vm3 = vcmask (!%p275_p2), 125952  }
   0x7   : > { %1343 = vmatpush3.bf16.msra.mxu0 (!%p275_p2), %v1463_v0  ;;  %1412 = vmatpush3.bf16.msra.mxu1 (!%p275_p2), %v1463_v0 }
   0x8   : > { %1344 = vmatprep.subr.bf16.mxu0 (!%p275_p2), %v1464_v1  ;;  %1411 = vmatprep.subr.bf16.mxu1 (!%p275_p2), %v1464_v1 }
   0xb   : > { %1345 = vmatpush3.bf16.msra.mxu0 (!%p275_p2), %v1464_v1  ;;  %1413 = vmatpush3.bf16.msra.mxu1 (!%p275_p2), %v1464_v1 }
   0xc   : > { %1362 = vmatprep.subr.bf16.mxu1 (!%p275_p2), %v1550_v34 }
   0xd   : > { %s1689_s29 = smov (!%p314_p3, %s1153_s29), 31 }
   0xe   : > { %s1541_s12 = sshll.u32 %s1689_s29, 2 }
   0xf   : > { %s323_s15 = scalar_lea.vmem %s1680_s1, %s1541_s12  ;;  %s1557_s21 = scalar_lea.vmem %s1679_s0, %s1541_s12 }
  0x10   : > { %v1263_v2 = vld [vmem:[%s323_s15] sm:$0xff]   ;;  %v1301_v3 = vld [vmem:[%s323_s15 + $0x8] sm:$0xff]   ;;  %v1302_v4 = vld [vmem:[%s323_s15 + $0x10] sm:$0xff]   ;;  %s1642_s24 = scalar_lea.vmem %s1687_s8, %s1541_s12 }
  0x11   : > { %v1264_v5 = vunpack.c.l.bf16 %v1263_v2  ;;  %v1265_v6 = vunpack.c.h.bf16 %v1263_v2  ;;  %v1268_v7 = vunpack.c.l.bf16 %v1301_v3  ;;  %v1269_v8 = vunpack.c.h.bf16 %v1301_v3  ;;  %v1303_v9 = vld [vmem:[%s323_s15 + $0x18] sm:$0xff]   ;;  %v1304_v14 = vld [vmem:[%s323_s15 + $0x20] sm:$0xff]   ;;  %v1305_v16 = vld [vmem:[%s323_s15 + $0x28] sm:$0xff]  }
  0x12   : > { %v1272_v10 = vunpack.c.l.bf16 %v1302_v4  ;;  %v1273_v11 = vunpack.c.h.bf16 %v1302_v4  ;;  %v1276_v12 = vunpack.c.l.bf16 %v1303_v9  ;;  %v1277_v13 = vunpack.c.h.bf16 %v1303_v9  ;;  %v1306_v24 = vld [vmem:[%s323_s15 + $0x30] sm:$0xff]   ;;  %v1307_v25 = vld [vmem:[%s323_s15 + $0x38] sm:$0xff]   ;;  %v1231_v35 = vld [vmem:[%s1557_s21] sm:$0xff]  }
  0x13   : > { %v1423_v15 = vpack.i.bf16 %v1265_v6, %v1264_v5  ;;  %v1428_v18 = vpack.i.bf16 %v1269_v8, %v1268_v7  ;;  %v1280_v19 = vunpack.c.l.bf16 %v1304_v14  ;;  %v1281_v20 = vunpack.c.h.bf16 %v1304_v14  ;;  %v1295_v36 = vld [vmem:[%s1557_s21 + $0x10] sm:$0xff]   ;;  %v1294_v40 = vld [vmem:[%s1557_s21 + $0x8] sm:$0xff]   ;;  %v1296_v48 = vld [vmem:[%s1557_s21 + $0x18] sm:$0xff]  }
  0x14   : > { %v1433_v17 = vpack.i.bf16 %v1273_v11, %v1272_v10  ;;  %v1438_v21 = vpack.i.bf16 %v1277_v13, %v1276_v12  ;;  %v1284_v22 = vunpack.c.l.bf16 %v1305_v16  ;;  %v1285_v23 = vunpack.c.h.bf16 %v1305_v16  ;;  %v1297_v53 = vld [vmem:[%s1557_s21 + $0x20] sm:$0xff]   ;;  %v1298_v62 = vld [vmem:[%s1557_s21 + $0x28] sm:$0xff]   ;;  %v1299_v3 = vld [vmem:[%s1557_s21 + $0x30] sm:$0xff]  }
  0x15   : > { %1424 = vrot.lane.b32.xlu0 %v1423_v15, %s1481_s16  ;;  %v1443_v26 = vpack.i.bf16 %v1281_v20, %v1280_v19  ;;  %v1288_v27 = vunpack.c.l.bf16 %v1306_v24  ;;  %v1289_v28 = vunpack.c.h.bf16 %v1306_v24  ;;  %v1292_v30 = vunpack.c.l.bf16 %v1307_v25  ;;  %v1300_v8 = vld [vmem:[%s1557_s21 + $0x38] sm:$0xff]  }
  0x16   : > { %1434 = vrot.lane.b32.xlu1 %v1433_v17, %s1481_s16  ;;  %v1448_v29 = vpack.i.bf16 %v1285_v23, %v1284_v22  ;;  %v1293_v31 = vunpack.c.h.bf16 %v1307_v25  ;;  %v1232_v37 = vunpack.c.l.bf16 %v1231_v35  ;;  %v1233_v38 = vunpack.c.h.bf16 %v1231_v35  ;;  %v1466_v35 = vld [vmem:[%s1683_s4 + $0x8] sm:$0xff]  }
  0x17   : > { %v1453_v32 = vpack.i.bf16 %v1289_v28, %v1288_v27  ;;  %v1240_v41 = vunpack.c.l.bf16 %v1295_v36  ;;  %v1241_v42 = vunpack.c.h.bf16 %v1295_v36  ;;  %v1236_v49 = vunpack.c.l.bf16 %v1294_v40 }
  0x18   : > { %v1458_v33 = vpack.i.bf16 %v1293_v31, %v1292_v30  ;;  %v1237_v50 = vunpack.c.h.bf16 %v1294_v40  ;;  %v1244_v61 = vunpack.c.l.bf16 %v1296_v48  ;;  %v1245_v0 = vunpack.c.h.bf16 %v1296_v48  ;;  %v1159_v48 = vld [vmem:[%s1682_s3] ss:$0 sm:$0xff] }
  0x19   : > { %1429 = vrot.lane.b32.xlu0 %v1428_v18, %s1481_s16  ;;  %v1248_v1 = vunpack.c.l.bf16 %v1297_v53  ;;  %v1249_v2 = vunpack.c.h.bf16 %v1297_v53  ;;  %v1252_v11 = vunpack.c.l.bf16 %v1298_v62  ;;  %v1253_v12 = vunpack.c.h.bf16 %v1298_v62 }
  0x1a   : > { %1439 = vrot.lane.b32.xlu1 %v1438_v21, %s1481_s16  ;;  %v1256_v16 = vunpack.c.l.bf16 %v1299_v3  ;;  %v1257_v19 = vunpack.c.h.bf16 %v1299_v3  ;;  %v1260_v20 = vunpack.c.l.bf16 %v1300_v8 }
  0x1d   : > { %1444 = vrot.lane.b32.xlu0 %v1443_v26, %s1481_s16 }
  0x1e   : > { %1449 = vrot.lane.b32.xlu1 %v1448_v29, %s1481_s16  ;;  %v1261_v29 = vunpack.c.h.bf16 %v1300_v8 }
  0x21   : > { %1454 = vrot.lane.b32.xlu0 %v1453_v32, %s1481_s16 }
  0x22   : > { %1459 = vrot.lane.b32.xlu1 %v1458_v33, %s1481_s16 }
  0x87   : > { %v1425_v39 = vpop.permute.xlu0 %1424 }
  0x88   : > { %v1427_v43 = vunpack.i.h.bf16 %v1425_v39  ;;  %v1426_v44 = vunpack.i.l.bf16 %v1425_v39  ;;  %v1435_v45 = vpop.permute.xlu1 %1434 }
  0x89   : > { %v1437_v46 = vunpack.i.h.bf16 %v1435_v45  ;;  %v1436_v47 = vunpack.i.l.bf16 %v1435_v45  ;;  %v1467_v45 = vld [vmem:[%s1683_s4 + $0x10] sm:$0xff]  }
  0x8a   : > { %v484_v51 = vsel %vm483_vm0, %v1232_v37, %v1426_v44  ;;  %v485_v52 = vsel %vm483_vm0, %v1233_v38, %v1427_v43 }
  0x8b   : > { %v1430_v54 = vpop.permute.xlu0 %1429  ;;  %v500_v55 = vpack.c.bf16 %v485_v52, %v484_v51  ;;  %v488_v56 = vsel %vm483_vm0, %v1240_v41, %v1436_v47  ;;  %v489_v57 = vsel %vm483_vm0, %v1241_v42, %v1437_v46  ;;  %v1468_v46 = vld [vmem:[%s1683_s4 + $0x18] sm:$0xff]   ;;  %v1470_v47 = vld [vmem:[%s1685_s6 + $0x8] sm:$0xff]  }
  0x8c   : > { %v1432_v58 = vunpack.i.h.bf16 %v1430_v54  ;;  %v1431_v59 = vunpack.i.l.bf16 %v1430_v54  ;;  %v1440_v60 = vpop.permute.xlu1 %1439  ;;  %v502_v63 = vpack.c.bf16 %v489_v57, %v488_v56 }
  0x8d   : > { %1346 = vmatprep.mubr.msk.bf16.mxu0 %vm526_vm1, %v500_v55  ;;  %v1442_v6 = vunpack.i.h.bf16 %v1440_v60  ;;  %v1441_v7 = vunpack.i.l.bf16 %v1440_v60 }
  0x8e   : > { %v486_v4 = vsel %vm483_vm0, %v1236_v49, %v1431_v59  ;;  %v487_v5 = vsel %vm483_vm0, %v1237_v50, %v1432_v58 }
  0x8f   : > { %v501_v9 = vpack.c.bf16 %v487_v5, %v486_v4  ;;  %v1445_v10 = vpop.permute.xlu0 %1444  ;;  %v490_v21 = vsel %vm483_vm0, %v1244_v61, %v1441_v7  ;;  %v491_v22 = vsel %vm483_vm0, %v1245_v0, %v1442_v6 }
  0x90   : > { %v1447_v13 = vunpack.i.h.bf16 %v1445_v10  ;;  %v1446_v14 = vunpack.i.l.bf16 %v1445_v10  ;;  %v1450_v15 = vpop.permute.xlu1 %1449  ;;  %v503_v36 = vpack.c.bf16 %v491_v22, %v490_v21 }
  0x91   : > { %1347 = vmatmul.mubr.msk.bf16.vlgmr.msra.gmra.mrb[0].mxu0 %vm526_vm1, %v501_v9  ;;  %v1452_v17 = vunpack.i.h.bf16 %v1450_v15  ;;  %v1451_v18 = vunpack.i.l.bf16 %v1450_v15 }
  0x92   : > { %1350 = vmatprep.mubr.msk.bf16.mxu0 %vm526_vm1, %v502_v63  ;;  %v492_v23 = vsel %vm483_vm0, %v1248_v1, %v1446_v14  ;;  %v493_v24 = vsel %vm483_vm0, %v1249_v2, %v1447_v13 }
  0x93   : > { %v494_v25 = vsel %vm483_vm0, %v1252_v11, %v1451_v18  ;;  %v495_v26 = vsel %vm483_vm0, %v1253_v12, %v1452_v17  ;;  %v504_v27 = vpack.c.bf16 %v493_v24, %v492_v23  ;;  %v1455_v28 = vpop.permute.xlu0 %1454 }
  0x94   : > { %v505_v30 = vpack.c.bf16 %v495_v26, %v494_v25  ;;  %v1457_v31 = vunpack.i.h.bf16 %v1455_v28  ;;  %v1456_v32 = vunpack.i.l.bf16 %v1455_v28  ;;  %v1460_v33 = vpop.permute.xlu1 %1459 }
  0x95   : > { %1354 = vmatprep.mubr.msk.bf16.mxu1 %vm526_vm1, %v504_v27  ;;  %v1462_v37 = vunpack.i.h.bf16 %v1460_v33  ;;  %v1461_v38 = vunpack.i.l.bf16 %v1460_v33 }
  0x96   : > { %1355 = vmatmul.mubr.msk.bf16.vlgmr.msra.gmra.mrb[0].mxu1 %vm526_vm1, %v505_v30  ;;  %v496_v39 = vsel %vm483_vm0, %v1256_v16, %v1456_v32  ;;  %v497_v40 = vsel %vm483_vm0, %v1257_v19, %v1457_v31 }
  0x97   : > { %v506_v41 = vpack.c.bf16 %v497_v40, %v496_v39  ;;  %v498_v42 = vsel %vm483_vm0, %v1260_v20, %v1461_v38  ;;  %v499_v43 = vsel %vm483_vm0, %v1261_v29, %v1462_v37  ;;  %1363 = vmatpush3.bf16.msra.mxu1 %v1550_v34  ;;  %v1469_v34 = vld [vmem:[%s1685_s6] sm:$0xff]  }
  0x98   : > { %1364 = vmatprep.subr.bf16.mxu1 %v1466_v35  ;;  %v507_v44 = vpack.c.bf16 %v499_v43, %v498_v42  ;;  %1386 = vmatprep.subr.bf16.mxu0 %v1469_v34  ;;  %v1471_v42 = vld [vmem:[%s1685_s6 + $0x10] sm:$0xff]   ;;  %v1472_v43 = vld [vmem:[%s1685_s6 + $0x18] sm:$0xff]  }
  0x99   : > { %1351 = vmatmul.mubr.msk.bf16.gmra.mrb[4].mxu0 %vm526_vm1, %v503_v36  ;;  %1358 = vmatprep.mubr.msk.bf16.mxu1 %vm526_vm1, %v506_v41 }
  0x9a   : > { %1387 = vmatpush3.bf16.msra.mxu0 %v1469_v34 }
  0x9b   : > { %1365 = vmatpush3.bf16.msra.mxu1 %v1466_v35  ;;  %1388 = vmatprep.subr.bf16.mxu0 %v1470_v47 }
  0x9c   : > { %1366 = vmatprep.subr.bf16.mxu1 %v1467_v45 }
  0x9e   : > { %1359 = vmatmul.mubr.msk.bf16.gmra.mrb[4].mxu1 %vm526_vm1, %v507_v44  ;;  %1389 = vmatpush3.bf16.msra.mxu0 %v1470_v47  ;;  %v1170_v44 = vld [vmem:[%s1684_s5] ss:$0 sm:$0xff] }
  0x9f   : > { %1367 = vmatpush3.bf16.msra.mxu1 %v1467_v45  ;;  %1390 = vmatprep.subr.bf16.mxu0 %v1471_v42 }
  0xa0   : > { %1368 = vmatprep.subr.bf16.mxu1 %v1468_v46 }
  0xa2   : > { %1391 = vmatpush3.bf16.msra.mxu0 %v1471_v42 }
  0xa3   : > { %1369 = vmatpush3.bf16.msra.mxu1 %v1468_v46  ;;  %1392 = vmatprep.subr.bf16.mxu0 %v1472_v43 }
  0xa6   : > { %1393 = vmatpush3.bf16.msra.mxu0 %v1472_v43 }
 0x164   : > { %v1348_v49 = vpop.f32.mrb[0].mxu0 }
 0x165   : > { %v594_v50 = vadd.f32 %v1348_v49, %v1159_v48  ;;  %v585_v51 = vpop.f32.mrb[1].mxu0 }
 0x166   : > { %v586_v52 = vadd.f32 %v1159_v48, %v585_v51  ;;  %v1349_v53 = vpop.f32.mrb[2].mxu0 }
 0x167   : > { %v597_v54 = vadd.f32 %v1349_v53, %v1159_v48  ;;  %v588_v55 = vpop.f32.mrb[3].mxu0  ;;  %v650_v57 = vmax.f32 %v594_v50, 0.0 }
 0x168   : > { %v589_v56 = vadd.f32 %v1159_v48, %v588_v55  ;;  %v648_v60 = vmax.f32 %v586_v52, 0.0 }
 0x169   : > { %v651_v58 = vmax.f32 %v597_v54, 0.0  ;;  %v1356_v59 = vpop.f32.mrb[0].mxu1 }
 0x16a   : > { %v649_v61 = vmax.f32 %v589_v56, 0.0  ;;  %v626_v62 = vadd.f32 %v1356_v59, %v1159_v48  ;;  %v617_v63 = vpop.f32.mrb[1].mxu1 }
 0x16b   : > { %v665_v0 = vpack.c.bf16 %v651_v58, %v650_v57  ;;  %v618_v1 = vadd.f32 %v1159_v48, %v617_v63  ;;  %v1357_v2 = vpop.f32.mrb[2].mxu1 }
 0x16c   : > { %v664_v3 = vpack.c.bf16 %v649_v61, %v648_v60  ;;  %v1352_v4 = vpop.f32.mrb[4].mxu0  ;;  %v658_v5 = vmax.f32 %v626_v62, 0.0  ;;  %v629_v6 = vadd.f32 %v1357_v2, %v1159_v48  ;;  %v620_v7 = vpop.f32.mrb[3].mxu1 }
 0x16d   : > { %v610_v8 = vadd.f32 %v1352_v4, %v1159_v48  ;;  %v601_v9 = vpop.f32.mrb[5].mxu0  ;;  %v656_v10 = vmax.f32 %v618_v1, 0.0  ;;  %v621_v11 = vadd.f32 %v1159_v48, %v620_v7 }
 0x16e   : > { %v602_v12 = vadd.f32 %v1159_v48, %v601_v9  ;;  %v1353_v13 = vpop.f32.mrb[6].mxu0  ;;  %1370 = vmatprep.mubr.msk.bf16.mxu1 %vm702_vm2, %v664_v3  ;;  %v659_v14 = vmax.f32 %v629_v6, 0.0 }
 0x16f   : > { %v613_v15 = vadd.f32 %v1353_v13, %v1159_v48  ;;  %v604_v16 = vpop.f32.mrb[7].mxu0  ;;  %1371 = vmatmul.mubr.msk.bf16.vlgmr.msra.gmra.mrb[8].mxu1 %vm702_vm2, %v665_v0  ;;  %v657_v17 = vmax.f32 %v621_v11, 0.0  ;;  %v654_v20 = vmax.f32 %v610_v8, 0.0 }
 0x170   : > { %v605_v18 = vadd.f32 %v1159_v48, %v604_v16  ;;  %v669_v19 = vpack.c.bf16 %v659_v14, %v658_v5  ;;  %v652_v24 = vmax.f32 %v602_v12, 0.0 }
 0x171   : > { %v655_v21 = vmax.f32 %v613_v15, 0.0  ;;  %v668_v22 = vpack.c.bf16 %v657_v17, %v656_v10  ;;  %v1360_v23 = vpop.f32.mrb[4].mxu1 }
 0x172   : > { %v653_v25 = vmax.f32 %v605_v18, 0.0  ;;  %v642_v26 = vadd.f32 %v1360_v23, %v1159_v48  ;;  %v633_v27 = vpop.f32.mrb[5].mxu1 }
 0x173   : > { %v667_v28 = vpack.c.bf16 %v655_v21, %v654_v20  ;;  %v634_v29 = vadd.f32 %v1159_v48, %v633_v27  ;;  %v1361_v30 = vpop.f32.mrb[6].mxu1 }
 0x174   : > { %v666_v31 = vpack.c.bf16 %v653_v25, %v652_v24  ;;  %v662_v32 = vmax.f32 %v642_v26, 0.0  ;;  %v645_v33 = vadd.f32 %v1361_v30, %v1159_v48  ;;  %v636_v35 = vpop.f32.mrb[7].mxu1 }
 0x175   : > { %v660_v36 = vmax.f32 %v634_v29, 0.0  ;;  %v637_v37 = vadd.f32 %v1159_v48, %v636_v35 }
 0x176   : > { %1374 = vmatprep.mubr.msk.bf16.mxu1 %vm702_vm2, %v666_v31  ;;  %v663_v38 = vmax.f32 %v645_v33, 0.0 }
 0x177   : > { %1375 = vmatmul.mubr.msk.bf16.gmra.mrb[12].mxu1 %vm702_vm2, %v667_v28  ;;  %v661_v39 = vmax.f32 %v637_v37, 0.0  ;;  %v1183_v37 = vld [vmem:[%s1686_s7] ss:$0 sm:$0xff] }
 0x178   : > { %v671_v40 = vpack.c.bf16 %v663_v38, %v662_v32  ;;  %1378 = vmatprep.mubr.msk.bf16.mxu1 %vm702_vm2, %v668_v22 }
 0x179   : > { %v670_v41 = vpack.c.bf16 %v661_v39, %v660_v36 }
 0x17f   : > { %1379 = vmatmul.mubr.msk.bf16.gmra.mrb[16].mxu1 %vm702_vm2, %v669_v19 }
 0x180   : > { %1382 = vmatprep.mubr.msk.bf16.mxu1 %vm702_vm2, %v670_v41 }
 0x187   : > { %1383 = vmatmul.mubr.msk.bf16.gmra.mrb[20].mxu1 %vm702_vm2, %v671_v40 }
 0x242   : > { %v1372_v45 = vpop.f32.mrb[8].mxu1 }
 0x243   : > { %v770_v46 = vadd.f32 %v1372_v45, %v1170_v44  ;;  %v761_v34 = vpop.f32.mrb[9].mxu1 }
 0x244   : > { %v762_v47 = vadd.f32 %v1170_v44, %v761_v34  ;;  %v1373_v48 = vpop.f32.mrb[10].mxu1 }
 0x245   : > { %v773_v49 = vadd.f32 %v1373_v48, %v1170_v44  ;;  %v764_v50 = vpop.f32.mrb[11].mxu1  ;;  %v826_v52 = vmax.f32 %v770_v46, 0.0 }
 0x246   : > { %v765_v51 = vadd.f32 %v1170_v44, %v764_v50  ;;  %v824_v54 = vmax.f32 %v762_v47, 0.0 }
 0x247   : > { %v827_v53 = vmax.f32 %v773_v49, 0.0 }
 0x248   : > { %v825_v55 = vmax.f32 %v765_v51, 0.0 }
 0x249   : > { %v841_v56 = vpack.c.bf16 %v827_v53, %v826_v52 }
 0x24a   : > { %v840_v57 = vpack.c.bf16 %v825_v55, %v824_v54  ;;  %v1376_v58 = vpop.f32.mrb[12].mxu1 }
 0x24b   : > { %v786_v59 = vadd.f32 %v1376_v58, %v1170_v44  ;;  %v777_v60 = vpop.f32.mrb[13].mxu1 }
 0x24c   : > { %v778_v61 = vadd.f32 %v1170_v44, %v777_v60  ;;  %v1377_v62 = vpop.f32.mrb[14].mxu1  ;;  %1394 = vmatprep.mubr.msk.bf16.mxu0 %vm702_vm2, %v840_v57 }
 0x24d   : > { %v789_v63 = vadd.f32 %v1377_v62, %v1170_v44  ;;  %v780_v0 = vpop.f32.mrb[15].mxu1  ;;  %1395 = vmatmul.mubr.msk.bf16.vlgmr.msra.gmra.mrb[8].mxu0 %vm702_vm2, %v841_v56  ;;  %v830_v2 = vmax.f32 %v786_v59, 0.0 }
 0x24e   : > { %v781_v1 = vadd.f32 %v1170_v44, %v780_v0  ;;  %v828_v4 = vmax.f32 %v778_v61, 0.0 }
 0x24f   : > { %v831_v3 = vmax.f32 %v789_v63, 0.0 }
 0x250   : > { %v829_v5 = vmax.f32 %v781_v1, 0.0 }
 0x251   : > { %v843_v6 = vpack.c.bf16 %v831_v3, %v830_v2 }
 0x252   : > { %v842_v7 = vpack.c.bf16 %v829_v5, %v828_v4  ;;  %v1380_v8 = vpop.f32.mrb[16].mxu1 }
 0x253   : > { %v802_v9 = vadd.f32 %v1380_v8, %v1170_v44  ;;  %v793_v10 = vpop.f32.mrb[17].mxu1 }
 0x254   : > { %v794_v11 = vadd.f32 %v1170_v44, %v793_v10  ;;  %v1381_v12 = vpop.f32.mrb[18].mxu1  ;;  %1398 = vmatprep.mubr.msk.bf16.mxu0 %vm702_vm2, %v842_v7 }
 0x255   : > { %v805_v13 = vadd.f32 %v1381_v12, %v1170_v44  ;;  %v796_v14 = vpop.f32.mrb[19].mxu1  ;;  %1399 = vmatmul.mubr.msk.bf16.gmra.mrb[12].mxu0 %vm702_vm2, %v843_v6  ;;  %v834_v16 = vmax.f32 %v802_v9, 0.0 }
 0x256   : > { %v797_v15 = vadd.f32 %v1170_v44, %v796_v14  ;;  %v832_v18 = vmax.f32 %v794_v11, 0.0 }
 0x257   : > { %v835_v17 = vmax.f32 %v805_v13, 0.0 }
 0x258   : > { %v833_v19 = vmax.f32 %v797_v15, 0.0 }
 0x259   : > { %v845_v20 = vpack.c.bf16 %v835_v17, %v834_v16 }
 0x25a   : > { %v844_v21 = vpack.c.bf16 %v833_v19, %v832_v18  ;;  %v1384_v22 = vpop.f32.mrb[20].mxu1 }
 0x25b   : > { %v818_v23 = vadd.f32 %v1384_v22, %v1170_v44  ;;  %v809_v24 = vpop.f32.mrb[21].mxu1 }
 0x25c   : > { %v810_v25 = vadd.f32 %v1170_v44, %v809_v24  ;;  %v1385_v26 = vpop.f32.mrb[22].mxu1  ;;  %1402 = vmatprep.mubr.msk.bf16.mxu0 %vm702_vm2, %v844_v21 }
 0x25d   : > { %v821_v27 = vadd.f32 %v1385_v26, %v1170_v44  ;;  %v812_v28 = vpop.f32.mrb[23].mxu1  ;;  %1403 = vmatmul.mubr.msk.bf16.gmra.mrb[16].mxu0 %vm702_vm2, %v845_v20  ;;  %v838_v30 = vmax.f32 %v818_v23, 0.0 }
 0x25e   : > { %v813_v29 = vadd.f32 %v1170_v44, %v812_v28  ;;  %v836_v32 = vmax.f32 %v810_v25, 0.0 }
 0x25f   : > { %v839_v31 = vmax.f32 %v821_v27, 0.0 }
 0x260   : > { %v837_v33 = vmax.f32 %v813_v29, 0.0 }
 0x261   : > { %v847_v35 = vpack.c.bf16 %v839_v31, %v838_v30 }
 0x262   : > { %v846_v36 = vpack.c.bf16 %v837_v33, %v836_v32 }
 0x264   : > { %1406 = vmatprep.mubr.msk.bf16.mxu0 %vm702_vm2, %v846_v36 }
 0x265   : > { %1407 = vmatmul.mubr.msk.bf16.gmra.mrb[20].mxu0 %vm702_vm2, %v847_v35 }
 0x320   : > { %v1396_v38 = vpop.f32.mrb[8].mxu0 }
 0x321   : > { %v945_v39 = vadd.f32 %v1396_v38, %v1183_v37  ;;  %v936_v40 = vpop.f32.mrb[9].mxu0 }
 0x322   : > { %v937_v41 = vadd.f32 %v1183_v37, %v936_v40  ;;  %v1397_v42 = vpop.f32.mrb[10].mxu0 }
 0x323   : > { %v1216_v43 = vpack.c.bf16 %v945_v39, %v945_v39  ;;  %v948_v44 = vadd.f32 %v1397_v42, %v1183_v37  ;;  %v939_v45 = vpop.f32.mrb[11].mxu0 }
 0x324   : > { %v1214_v46 = vpack.c.bf16 %v937_v41, %v937_v41  ;;  %v940_v34 = vadd.f32 %v1183_v37, %v939_v45 }
 0x325   : > { %1066 = vst.msk [vmem:[%s1642_s24 + $0x8] sm:$0xf] %vm1063_vm3, %v1216_v43  ;;  %v1217_v47 = vpack.c.bf16 %v948_v44, %v948_v44 }
 0x326   : > { %1064 = vst.msk [vmem:[%s1642_s24] sm:$0xf] %vm1063_vm3, %v1214_v46  ;;  %v1215_v48 = vpack.c.bf16 %v940_v34, %v940_v34 }
 0x327   : > { %1067 = vst.msk [vmem:[%s1642_s24 + $0xc] sm:$0xf] %vm1063_vm3, %v1217_v47 }
 0x328   : > { %1065 = vst.msk [vmem:[%s1642_s24 + $0x4] sm:$0xf] %vm1063_vm3, %v1215_v48  ;;  %v1400_v49 = vpop.f32.mrb[12].mxu0 }
 0x329   : > { %v961_v50 = vadd.f32 %v1400_v49, %v1183_v37  ;;  %v952_v51 = vpop.f32.mrb[13].mxu0 }
 0x32a   : > { %v953_v52 = vadd.f32 %v1183_v37, %v952_v51  ;;  %v1401_v53 = vpop.f32.mrb[14].mxu0 }
 0x32b   : > { %v1220_v54 = vpack.c.bf16 %v961_v50, %v961_v50  ;;  %v964_v55 = vadd.f32 %v1401_v53, %v1183_v37  ;;  %v955_v56 = vpop.f32.mrb[15].mxu0 }
 0x32c   : > { %v1218_v57 = vpack.c.bf16 %v953_v52, %v953_v52  ;;  %v956_v58 = vadd.f32 %v1183_v37, %v955_v56 }
 0x32d   : > { %1070 = vst.msk [vmem:[%s1642_s24 + $0x18] sm:$0xf] %vm1063_vm3, %v1220_v54  ;;  %v1221_v59 = vpack.c.bf16 %v964_v55, %v964_v55 }
 0x32e   : > { %1068 = vst.msk [vmem:[%s1642_s24 + $0x10] sm:$0xf] %vm1063_vm3, %v1218_v57  ;;  %v1219_v60 = vpack.c.bf16 %v956_v58, %v956_v58 }
 0x32f   : > { %1071 = vst.msk [vmem:[%s1642_s24 + $0x1c] sm:$0xf] %vm1063_vm3, %v1221_v59 }
 0x330   : > { %1069 = vst.msk [vmem:[%s1642_s24 + $0x14] sm:$0xf] %vm1063_vm3, %v1219_v60  ;;  %v1404_v61 = vpop.f32.mrb[16].mxu0 }
 0x331   : > { %v977_v62 = vadd.f32 %v1404_v61, %v1183_v37  ;;  %v968_v63 = vpop.f32.mrb[17].mxu0 }
 0x332   : > { %v969_v0 = vadd.f32 %v1183_v37, %v968_v63  ;;  %v1405_v1 = vpop.f32.mrb[18].mxu0 }
 0x333   : > { %v1224_v2 = vpack.c.bf16 %v977_v62, %v977_v62  ;;  %v980_v3 = vadd.f32 %v1405_v1, %v1183_v37  ;;  %v971_v4 = vpop.f32.mrb[19].mxu0 }
 0x334   : > { %v1222_v5 = vpack.c.bf16 %v969_v0, %v969_v0  ;;  %v972_v6 = vadd.f32 %v1183_v37, %v971_v4 }
 0x335   : > { %1074 = vst.msk [vmem:[%s1642_s24 + $0x28] sm:$0xf] %vm1063_vm3, %v1224_v2  ;;  %v1225_v7 = vpack.c.bf16 %v980_v3, %v980_v3 }
 0x336   : > { %1072 = vst.msk [vmem:[%s1642_s24 + $0x20] sm:$0xf] %vm1063_vm3, %v1222_v5  ;;  %v1223_v8 = vpack.c.bf16 %v972_v6, %v972_v6 }
 0x337   : > { %1075 = vst.msk [vmem:[%s1642_s24 + $0x2c] sm:$0xf] %vm1063_vm3, %v1225_v7 }
 0x338   : > { %1073 = vst.msk [vmem:[%s1642_s24 + $0x24] sm:$0xf] %vm1063_vm3, %v1223_v8  ;;  %v1408_v9 = vpop.f32.mrb[20].mxu0 }
 0x339   : > { %v993_v10 = vadd.f32 %v1408_v9, %v1183_v37  ;;  %v984_v11 = vpop.f32.mrb[21].mxu0 }
 0x33a   : > { %v985_v12 = vadd.f32 %v1183_v37, %v984_v11  ;;  %v1409_v13 = vpop.f32.mrb[22].mxu0 }
 0x33b   : > { %v1228_v14 = vpack.c.bf16 %v993_v10, %v993_v10  ;;  %v996_v15 = vadd.f32 %v1409_v13, %v1183_v37  ;;  %v987_v16 = vpop.f32.mrb[23].mxu0 }
 0x33c   : > { %v1226_v17 = vpack.c.bf16 %v985_v12, %v985_v12  ;;  %v988_v18 = vadd.f32 %v1183_v37, %v987_v16 }
 0x33d   : > { %1078 = vst.msk [vmem:[%s1642_s24 + $0x38] sm:$0xf] %vm1063_vm3, %v1228_v14  ;;  %v1229_v19 = vpack.c.bf16 %v996_v15, %v996_v15 }
 0x33e   : > { %1076 = vst.msk [vmem:[%s1642_s24 + $0x30] sm:$0xf] %vm1063_vm3, %v1226_v17  ;;  %v1227_v20 = vpack.c.bf16 %v988_v18, %v988_v18 }
 0x33f   : > { %1079 = vst.msk [vmem:[%s1642_s24 + $0x3c] sm:$0xf] %vm1063_vm3, %v1229_v19 }
 0x340   : > { %1077 = vst.msk [vmem:[%s1642_s24 + $0x34] sm:$0xf] %vm1063_vm3, %v1227_v20 }
 0x341 PF: > { %s18_s27 = sadd.s32 1, %s1479_s27  }
 0x342   : > { %p15_p4 = scmp.ge.s32.totalorder %s18_s27, 4  }
 0x344   :  { %17 = sbr.rel (!%p15_p4) target bundleno = 1 (0x1), region = 85 }

</bundles_post_ra>
